<compile_context>
chip_gen: v7x
topology: tpu7x:2x2x1
jax: 0.10.0
libtpu: 0.0.40
codegen_flags: <defaults>
</compile_context>

<pallas_src>
import functools

import jax
import jax.numpy as jnp
from jax import lax
from jax.experimental import pallas as pl
from jax.experimental.pallas import tpu as pltpu


def _round_up(x, m):
    return (x + m - 1) // m * m


# --------------------------------------------------------------------------
# Kernel 1: time-independent input projection  xw = X @ [W_xr|W_xz|W_xh] + b
# --------------------------------------------------------------------------
def xproj_kernel(x_ref, wx_ref, b_ref, xw_ref):
    x = x_ref[...].astype(wx_ref.dtype)
    xw = jnp.dot(x, wx_ref[...], preferred_element_type=jnp.float32) + b_ref[...]
    xw_ref[...] = xw.astype(xw_ref.dtype)


# --------------------------------------------------------------------------
# Kernel 2: the serial GRU recurrence over one block of TB timesteps.
# --------------------------------------------------------------------------
def gru_recurrence_kernel(xw_ref, h0_ref, whrz_ref, whh_ref,
                          out_ref, hfin_ref, h_scratch, *, unroll):
    """xw_ref   : (TB*B, 3*Hp)  precomputed X-projections (+bias) for this block
       h0_ref   : (B, Hp)       initial hidden state (zero-padded), resident
       whrz_ref : (Hp, 2*Hp)    concat(W_hr, W_hz), zero-padded, resident
       whh_ref  : (Hp, Hp)      W_hh, zero-padded, resident
       out_ref  : (TB*B, Hp)    stacked hidden states for this block
       hfin_ref : (B, Hp)       final hidden state (written on last block only)
       h_scratch: (B, Hp) f32   hidden state carried across grid steps
    """
    tb = pl.program_id(0)
    B, Hp = h_scratch.shape
    TB = out_ref.shape[0] // B

    @pl.when(tb == 0)
    def _():
        h_scratch[...] = h0_ref[...].astype(jnp.float32)

    whrz = whrz_ref[...]          # resident in VMEM; loaded once per block
    whh = whh_ref[...]
    mm_dtype = whrz.dtype         # matmul operand dtype (f32 or bf16)

    def step(i, H):
        # H lives in vregs across iterations (B x Hp f32) -- no VMEM round trip.
        row = pl.multiple_of(i * B, 8)
        xw_i = xw_ref[pl.ds(row, B), :].astype(jnp.float32)   # (B, 3*Hp)

        # Fused R/Z gates: one (B,Hp) x (Hp,2Hp) MXU matmul.
        rz = jax.nn.sigmoid(
            xw_i[:, : 2 * Hp]
            + jnp.dot(H.astype(mm_dtype), whrz, preferred_element_type=jnp.float32))
        R = rz[:, :Hp]
        Z = rz[:, Hp:]

        H_tilde = jnp.tanh(
            xw_i[:, 2 * Hp:]
            + jnp.dot((H * R).astype(mm_dtype), whh,
                      preferred_element_type=jnp.float32))

        # NOTE: faithfully reproduces the module's update rule ((1 - R), not (1 - Z)).
        H_new = Z * H + (1.0 - R) * H_tilde

        out_ref[pl.ds(row, B), :] = H_new.astype(out_ref.dtype)  # dense 128-lane store
        return H_new

    H_final = lax.fori_loop(0, TB, step, h_scratch[...], unroll=unroll)
    h_scratch[...] = H_final      # single VMEM write per block (carries across blocks)

    @pl.when(tb == pl.num_programs(0) - 1)
    def _():
        hfin_ref[...] = H_final.astype(hfin_ref.dtype)


# --------------------------------------------------------------------------
# Wrapper
# --------------------------------------------------------------------------
def gru_scratch_forward(inputs, H0, params, *, time_block=None,
                        matmul_dtype=jnp.float32, out_dtype=jnp.float32):
    """inputs: (T, B, D); H0: (B, H); params: dict matching the PyTorch module.

    Returns (outputs (T, B, H) f32, final H (B, H) f32).
    """
    T, B0, D = inputs.shape
    Hd = params["W_xr"].shape[1]
    Hp = _round_up(Hd, 128)          # lane-dense hidden width
    pad_h = Hp - Hd

    # Pad batch to a multiple of 8 sublanes (extra rows are zero; sliced off later).
    B = _round_up(max(B0, 8), 8)
    pad_b = B - B0

    # ---- choose the time block: several grid steps (pipelining) + VMEM cap ----
    if time_block is None:
        per_step_bytes = 2 * B * (3 * Hp + Hp) * 4       # xw + out, double-buffered
        tb_cap = max(1, (24 * 1024 * 1024) // per_step_bytes)
        target = T if T < 4 else min(max(1, T // 4), tb_cap)
        TB = next(tb for tb in range(int(target), 0, -1) if T % tb == 0)
    else:
        TB = time_block
        assert T % TB == 0, "time_block must divide T"
    n_blocks = T // TB
    unroll = min(TB, 8)

    # ---- fuse + zero-pad the weights once (outside the recurrence) ----
    f32 = jnp.float32
    pc = lambda w: jnp.pad(w.astype(f32), ((0, 0), (0, pad_h)))   # pad hidden cols
    pr = lambda w: jnp.pad(w, ((0, pad_h), (0, 0)))               # pad hidden rows
    W_x = jnp.concatenate(
        [pc(params["W_xr"]), pc(params["W_xz"]), pc(params["W_xh"])],
        axis=1).astype(matmul_dtype)                               # (D, 3Hp)
    b = jnp.concatenate(
        [jnp.pad(params["b_r"].astype(f32), (0, pad_h)),
         jnp.pad(params["b_z"].astype(f32), (0, pad_h)),
         jnp.pad(params["b_h"].astype(f32), (0, pad_h))]).reshape(1, 3 * Hp)
    W_hrz = jnp.concatenate(
        [pr(pc(params["W_hr"])), pr(pc(params["W_hz"]))],
        axis=1).astype(matmul_dtype)                               # (Hp, 2Hp)
    W_hh = pr(pc(params["W_hh"])).astype(matmul_dtype)             # (Hp, Hp)
    H0p = jnp.pad(H0.astype(f32), ((0, pad_b), (0, pad_h)))        # (B, Hp)
    x2 = jnp.pad(inputs.astype(f32),
                 ((0, 0), (0, pad_b), (0, 0))).reshape(T * B, D).astype(matmul_dtype)

    # ---- explicit VMEM limits (safe headroom, clamped for v7x's 64 MiB) ----
    def _vmem_limit(est_bytes):
        return int(min(max(2 * est_bytes, 16 * 1024 * 1024), 48 * 1024 * 1024))

    proj_est = (2 * TB * B * D * 4 + 2 * TB * B * 3 * Hp * 4
                + 2 * D * 3 * Hp * 4 + 3 * Hp * 4)
    rec_est = (2 * TB * B * 3 * Hp * 4 + 2 * TB * B * Hp * 4
               + (2 * Hp + Hp) * Hp * 4 + 4 * B * Hp * 4)

    # ---- pass 1: input projection (pure MXU throughput, fully parallel grid) ----
    xw = pl.pallas_call(
        xproj_kernel,
        out_shape=jax.ShapeDtypeStruct((T * B, 3 * Hp), jnp.float32),
        grid_spec=pltpu.PrefetchScalarGridSpec(
            num_scalar_prefetch=0,
            grid=(n_blocks,),
            in_specs=[
                pl.BlockSpec((TB * B, D), lambda t: (t, 0)),      # X rows
                pl.BlockSpec((D, 3 * Hp), lambda t: (0, 0)),      # fused W_x (resident)
                pl.BlockSpec((1, 3 * Hp), lambda t: (0, 0)),      # fused biases
            ],
            out_specs=pl.BlockSpec((TB * B, 3 * Hp), lambda t: (t, 0)),
        ),
        compiler_params=pltpu.CompilerParams(
            dimension_semantics=("parallel",),
            vmem_limit_bytes=_vmem_limit(proj_est)),
    )(x2, W_x, b)

    # ---- pass 2: serial recurrence; xw/out blocks pipelined by BlockSpec ----
    kernel = functools.partial(gru_recurrence_kernel, unroll=unroll)
    outs_p, hfin_p = pl.pallas_call(
        kernel,
        out_shape=(
            jax.ShapeDtypeStruct((T * B, Hp), out_dtype),
            jax.ShapeDtypeStruct((B, Hp), jnp.float32),
        ),
        grid_spec=pltpu.PrefetchScalarGridSpec(
            num_scalar_prefetch=0,
            grid=(n_blocks,),
            in_specs=[
                pl.BlockSpec((TB * B, 3 * Hp), lambda t: (t, 0)),  # xw (streamed/prefetched)
                pl.BlockSpec((B, Hp), lambda t: (0, 0)),           # H0 (resident)
                pl.BlockSpec((Hp, 2 * Hp), lambda t: (0, 0)),      # W_hr|W_hz (resident)
                pl.BlockSpec((Hp, Hp), lambda t: (0, 0)),          # W_hh (resident)
            ],
            out_specs=[
                pl.BlockSpec((TB * B, Hp), lambda t: (t, 0)),      # stacked hidden states
                pl.BlockSpec((B, Hp), lambda t: (0, 0)),           # final H (resident)
            ],
            scratch_shapes=[
                pltpu.VMEM((B, Hp), jnp.float32),                  # carried hidden state
            ],
        ),
        compiler_params=pltpu.CompilerParams(
            dimension_semantics=("arbitrary",),                    # time is serial
            vmem_limit_bytes=_vmem_limit(rec_est)),
    )(xw, H0p, W_hrz, W_hh)

    outs = outs_p.reshape(T, B, Hp)[:, :B0, :Hd].astype(jnp.float32)
    h_fin = hfin_p[:B0, :Hd]
    return outs, h_fin


# --------------------------------------------------------------------------
# Pure-JAX reference matching the PyTorch module exactly.
# --------------------------------------------------------------------------
def gru_reference(inputs, H0, p):
    H = H0
    outs = []
    for X in inputs:
        R = jax.nn.sigmoid(X @ p["W_xr"] + H @ p["W_hr"] + p["b_r"])
        Z = jax.nn.sigmoid(X @ p["W_xz"] + H @ p["W_hz"] + p["b_z"])
        H_tilde = jnp.tanh(X @ p["W_xh"] + (H * R) @ p["W_hh"] + p["b_h"])
        H = Z * H + (1.0 - R) * H_tilde
        outs.append(H)
    return jnp.stack(outs, axis=0), H


if __name__ == "__main__":
    T, B, D, Hd = 8, 8, 16, 32
    sigma = 0.01
    key = jax.random.PRNGKey(0)
    ks = jax.random.split(key, 8)

    params = {
        "W_xr": jax.random.normal(ks[0], (D, Hd), jnp.float32) * sigma,
        "W_hr": jax.random.normal(ks[1], (Hd, Hd), jnp.float32) * sigma,
        "b_r": jnp.zeros((Hd,), jnp.float32),
        "W_xz": jax.random.normal(ks[2], (D, Hd), jnp.float32) * sigma,
        "W_hz": jax.random.normal(ks[3], (Hd, Hd), jnp.float32) * sigma,
        "b_z": jnp.zeros((Hd,), jnp.float32),
        "W_xh": jax.random.normal(ks[4], (D, Hd), jnp.float32) * sigma,
        "W_hh": jax.random.normal(ks[5], (Hd, Hd), jnp.float32) * sigma,
        "b_h": jnp.zeros((Hd,), jnp.float32),
    }

    inputs = jax.random.normal(ks[6], (T, B, D), jnp.float32)
    H0 = jnp.zeros((B, Hd), jnp.float32)   # matches H=None default in the module

    outs, h_fin = gru_scratch_forward(inputs, H0, params)
    outs = jax.block_until_ready(outs)
    h_fin = jax.block_until_ready(h_fin)

    ref_outs, ref_h = gru_reference(inputs, H0, params)
    assert jnp.allclose(outs, ref_outs, atol=1e-5, rtol=1e-5), "outputs mismatch"
    assert jnp.allclose(h_fin, ref_h, atol=1e-5, rtol=1e-5), "final H mismatch"

    print("KERNEL_OK")
</pallas_src>

<mosaic_0001>
module attributes {stable_mosaic.version = 11 : i64} {
  func.func @xproj_kernel(%arg0: i32, %arg1: memref<16x16xf32, #tpu.memory_space<vmem>>, %arg2: memref<16x384xf32, #tpu.memory_space<vmem>>, %arg3: memref<1x384xf32, #tpu.memory_space<vmem>>, %arg4: memref<16x384xf32, #tpu.memory_space<vmem>>) attributes {dimension_semantics = [#tpu.dimension_semantics<parallel>], iteration_bounds = array<i64: 4>, scalar_prefetch = 0 : i64, scratch_operands = 0 : i64, tpu.core_type = #tpu.core_type<tc>, window_params = [{transform_indices = @transform_0, window_bounds = array<i64: 16, 16>}, {pipeline_mode = #tpu.pipeline_mode<synchronous>, transform_indices = @transform_1, window_bounds = array<i64: 16, 384>}, {pipeline_mode = #tpu.pipeline_mode<synchronous>, transform_indices = @transform_2, window_bounds = array<i64: 1, 384>}, {transform_indices = @transform_3, window_bounds = array<i64: 16, 384>}]} {
    %c0 = arith.constant 0 : index
    %c0_0 = arith.constant 0 : index
    %0 = vector.load %arg1[%c0, %c0_0] : memref<16x16xf32, #tpu.memory_space<vmem>>, vector<16x16xf32>
    %c0_1 = arith.constant 0 : index
    %c0_2 = arith.constant 0 : index
    %1 = vector.load %arg2[%c0_1, %c0_2] : memref<16x384xf32, #tpu.memory_space<vmem>>, vector<16x384xf32>
    %cst = arith.constant dense<0.000000e+00> : vector<16x384xf32>
    %2 = tpu.matmul %0, %1, %cst {dimension_numbers = #tpu.dot_dimension_numbers<[1], [0], [0], [1], [0, 0, 1, 1], [], []>} : vector<16x16xf32>, vector<16x384xf32>, vector<16x384xf32> -> vector<16x384xf32>
    %c0_3 = arith.constant 0 : index
    %c0_4 = arith.constant 0 : index
    %3 = vector.load %arg3[%c0_3, %c0_4] : memref<1x384xf32, #tpu.memory_space<vmem>>, vector<1x384xf32>
    %4 = vector.broadcast %3 : vector<1x384xf32> to vector<16x384xf32>
    %5 = arith.addf %2, %4 : vector<16x384xf32>
    %c0_5 = arith.constant 0 : index
    %c0_6 = arith.constant 0 : index
    %6 = vector.load %arg4[%c0_5, %c0_6] : memref<16x384xf32, #tpu.memory_space<vmem>>, vector<16x384xf32>
    tpu.vector_store %arg4[%c0_5, %c0_6], %5 {strides = array<i32>} : memref<16x384xf32, #tpu.memory_space<vmem>>, vector<16x384xf32>,
    return
  }
  func.func @transform_0(%arg0: i32) -> (i32, i32) {
    %c0_i32 = arith.constant 0 : i32
    %c0_i32_0 = arith.constant 0 : i32
    return %arg0, %c0_i32 : i32, i32
  }
  func.func @transform_1(%arg0: i32) -> (i32, i32) {
    %c0_i32 = arith.constant 0 : i32
    %c0_i32_0 = arith.constant 0 : i32
    %c0_i32_1 = arith.constant 0 : i32
    return %c0_i32, %c0_i32_0 : i32, i32
  }
  func.func @transform_2(%arg0: i32) -> (i32, i32) {
    %c0_i32 = arith.constant 0 : i32
    %c0_i32_0 = arith.constant 0 : i32
    %c0_i32_1 = arith.constant 0 : i32
    return %c0_i32, %c0_i32_0 : i32, i32
  }
  func.func @transform_3(%arg0: i32) -> (i32, i32) {
    %c0_i32 = arith.constant 0 : i32
    %c0_i32_0 = arith.constant 0 : i32
    return %arg0, %c0_i32 : i32, i32
  }
}

</mosaic_0001>

<bundles_post_ra>
// kernel: tpu_custom_call.1
= control target key start
LH: loop header
LB: loop body
LE: loop exit
PB: predicated region body
PF: predicated region fallthrough
CT: control target
= control target key end

     0   :  { %8 = vsyncpa [#allocation3], 0  ;;  %s732_s0 = inlined_call_operand.vmem [shape: f32[64,16], index: 0, kind: input, shape index: {}]   ;;  %s733_s1 = inlined_call_operand.vmem [shape: f32[16,384], index: 1, kind: input, shape index: {}]   ;;  %s734_s2 = inlined_call_operand.vmem [shape: f32[1,384], index: 2, kind: input, shape index: {}]   ;;  %s735_s3 = inlined_call_operand.hbm [shape: f32[64,384], index: 3, kind: output, shape index: {}]  }
   0x1   :  { %10 = vsyncpa [#allocation3 + $0x1], 0  ;;  %s605_s12 = smov 0   ;;  %s607_s13 = smov 0  }
   0x2   :  { %s609_s14 = smov 0   ;;  %s611_s15 = smov 0  }
   0x3 LB: > { %s626_s16 = sadd.s32 4294967295, %s579_s15   ;;  %s439_s17 = sadd.s32 4294967294, %s579_s15   ;;  %s579_s15 = sphi %s611_s15, %s741_s15   ;;  %s575_s14 = sphi %s609_s14, %s740_s14   ;;  %s571_s13 = sphi %s607_s13, %s739_s13   ;;  %s567_s12 = sphi %s605_s12, %s738_s12  }
   0x4   : > { %s630_s18 = sadd.s32 1, %s579_s15   ;;  %s91_s19 = sadd.s32 1, %s575_s14 }
   0x5   : > { %s88_s20 = ssub.s32 %s579_s15, %s630_s18  ;;  %p101_p0 = scmp.ne.s32.totalorder %s575_s14, %s571_s13 }
   0x6   : > { %p89_p1 = scmp.eq.s32.totalorder %s88_s20, 0  ;;  %p102_p2 = scmp.eq.s32.totalorder %s626_s16, 3 }
   0x7   : > { %p107_p3 = scmp.ne.s32.totalorder %s571_s13, %s567_s12  ;;  %p108_p4 = scmp.eq.s32.totalorder %s439_s17, 3 }
   0x8   : > { %s641_s21 = scalar_select %p89_p1, %s575_s14, %s91_s19  }
   0x9   : > { %p643_p5 = por %p102_p2, %p101_p0  ;;  %p647_p6 = por %p108_p4, %p107_p3 }
   0xa   : > { %p442_p7 = scmp.ge.s32.totalorder %s579_s15, 1  ;;  %p141_p8 = scmp.lt.s32.totalorder %s579_s15, 5 }
   0xc   : > { %p142_p9 = pnand %p442_p7, %p141_p8 }
   0xd   : > { %v175_v0 = vld [vmem:[%s733_s1 + $0x8] sm:$0xff] (!%p142_p9)  ;;  %v178_v1 = vld [vmem:[%s733_s1 + $0x20] sm:$0xff] (!%p142_p9)  ;;  %s443_s30 = sshll.u32 (!%p142_p9), %s626_s16, 1  ;;  %v177_v4 = vld [vmem:[%s733_s1 + $0x18] sm:$0xff] (!%p142_p9)  ;;  %v581_v5 = vmov (!%p142_p9), 0.0   ;;  %vm197_vm0 = vcmask (!%p142_p9), 130048   ;;  %v182_v12 = vlaneseq (!%p142_p9) }
   0xe   : > { %145 = sbr.rel (%p142_p9) target bundleno = 259 (0x103), region = 32  ;;  %v174_v2 = vld [vmem:[%s733_s1] sm:$0xff] (!%p142_p9)  ;;  %v465_v3 = vpack.c.bf16 (!%p142_p9), %v178_v1, %v175_v0  ;;  %268 = vmatprep.mubr.f32.mxu0 (!%p142_p9), %v581_v5  ;;  %v176_v6 = vld [vmem:[%s733_s1 + $0x10] sm:$0xff] (!%p142_p9)  ;;  %v179_v7 = vld [vmem:[%s733_s1 + $0x28] sm:$0xff] (!%p142_p9)  ;;  %p166_p10 = scmp.lt.s32.totalorder (!%p142_p9), %s443_s30, 7 }
   0xf   : > { %v467_v8 = vpack.c.bf16 (!%p142_p9), %v177_v4, %v174_v2  ;;  %v469_v9 = vpack.c.bf16 (!%p142_p9), %v179_v7, %v176_v6  ;;  %v183_v13 = vshrl.u32 (!%p142_p9), %v182_v12, 7  ;;  %s162_s20 = sand.u32 (!%p142_p9), 1, %s571_s13   ;;  %v180_v15 = vld [vmem:[%s734_s2] sm:$0x7] (!%p142_p9)  ;;  %s474_s27 = smul.u32 (!%p142_p9), 768, %s626_s16 }
  0x10   : > { %466 = vmatprep.subr.bf16.mxu0 (!%p142_p9), %v465_v3  ;;  %s473_s26 = smul.u32 (!%p142_p9), 48, %s162_s20  ;;  %s691_s5 = scalar_lea.sflag (!%p142_p9), [#allocation3], %s162_s20 }
  0x11   : > { %468 = vmatpush1.bf16.msra.mxu0 (!%p142_p9), %v467_v8  ;;  %470 = vmatprep.subr.bf16.mxu1 (!%p142_p9), %v469_v9  ;;  %v184_v14 = vsub.s32 (!%p142_p9), 0, %v183_v13  ;;  %v188_v16 = vsub.s32 (!%p142_p9), 1, %v183_v13  ;;  %v192_v17 = vsub.s32 (!%p142_p9), 2, %v183_v13  ;;  %s687_s4 = scalar_lea.hbm (!%p142_p9), %s735_s3, %s474_s27  ;;  %s582_s7 = smov (!%p142_p9), [#allocation2]  }
  0x12   : > { %472 = vmatpush3.bf16.msra.mxu1 (!%p142_p9), %v469_v9  ;;  %s164_s28 = scalar_lea.vmem (!%p142_p9), [#allocation2], %s473_s26  ;;  %s521_s8 = sshll.u32 (!%p142_p9), %s582_s7, 4  ;;  %s522_s8 = int_to_ptr.vmem [resolvable:$false] %s521_s8 }
  0x13   : > { %v185_v18 = vrot.slane (!%p142_p9), %v180_v15, %v184_v14  ;;  %v189_v19 = vrot.slane (!%p142_p9), %v180_v15, %v188_v16  ;;  %v193_v20 = vrot.slane (!%p142_p9), %v180_v15, %v192_v17  ;;  %s377_s29 = sshll.u32 (!%p142_p9), %s164_s28, 4  ;;  %s523_s9 = scalar_lea.vmem (!%p142_p9), %s522_s8, 1536  ;;  %s682_s29 = int_to_ptr.vmem [resolvable:$true] %s377_s29 }
  0x14   : > { %s517_s6 = scalar_lea.vmem (!%p142_p9), %s682_s29, 768  ;;  %p524_p0 = scmp.lt.s32.totalorder (!%p142_p9), %s682_s29, %s522_s8 }
  0x15   : > { %s743_s30 = smov (!%p166_p10, %s443_s30), 7  ;;  %p518_p11 = scmp.ne.s32.totalorder %s682_s29, %s517_s6 }
  0x16   : > { %s444_s10 = sshll.u32 %s743_s30, 3  ;;  %p525_p1 = scmp.lt.s32.totalorder %s523_s9, %s517_s6 }
  0x17   : > { %s169_s19 = scalar_lea.vmem %s732_s0, %s444_s10  ;;  %p519_p12 = pnand %p518_p11, %p643_p5 }
  0x18   : > { %v172_v10 = vld [vmem:[%s169_s19] sm:$0xff]  ;;  %v173_v11 = vld [vmem:[%s169_s19 + $0x8] sm:$0xff]  ;;  %p526_p2 = por %p525_p1, %p524_p0 }
  0x19   : > { %445 = vmatmul.mubr.msk.f32.vlgmr.msra.gmra.mrb[0].mxu0 %vm197_vm0, %v172_v10  ;;  %462 = vmatprep.mubr.msk.f32.mxu1 %vm197_vm0, %v172_v10  ;;  %p520_p13 = pneg %p519_p12 }
  0x1a   : > { %274 = vmatprep.mubr.f32.mxu0 %v581_v5  ;;  %463 = vmatmul.mubr.msk.f32.vlgmr.msra.gmra.mrb[0].mxu1 %vm197_vm0, %v173_v11 }
  0x1b   : > { %p527_p3 = pnand %p526_p2, %p520_p13 }
  0x1d   : > { %446 = vmatmul.mubr.msk.f32.gmra.mrb[2].mxu0 %vm197_vm0, %v173_v11 }
  0xec   : > { %v270_v21 = vpop.f32.mrb[0].mxu0 }
  0xed   : > { %v271_v22 = vadd.f32 %v270_v21, %v185_v18  ;;  %v272_v23 = vpop.f32.mrb[1].mxu0  ;;  %v464_v24 = vpop.f32.mrb[0].mxu1 }
  0xee   : > { %v273_v25 = vadd.f32 %v272_v23, %v189_v19  ;;  %v353_v26 = vadd.f32 %v464_v24, %v193_v20  ;;  %v347_v27 = vpop.f32.mrb[1].mxu1 }
  0xef   : > { %356 = vst [vmem:[%s164_s28] sm:$0xff] %v271_v22  ;;  %v348_v28 = vadd.f32 %v347_v27, %v193_v20 }
  0xf0   : > { %357 = vst [vmem:[%s164_s28 + $0x8] sm:$0xff] %v273_v25  ;;  %361 = vst [vmem:[%s164_s28 + $0x28] sm:$0xff] %v353_v26  ;;  %v276_v29 = vpop.f32.mrb[2].mxu0 }
  0xf1   : > { %v277_v30 = vadd.f32 %v276_v29, %v185_v18  ;;  %358 = vst [vmem:[%s164_s28 + $0x10] sm:$0xff] %v348_v28  ;;  %v278_v31 = vpop.f32.mrb[3].mxu0 }
  0xf2   : > { %v279_v32 = vadd.f32 %v278_v31, %v189_v19 }
  0xf3   : > { %359 = vst [vmem:[%s164_s28 + $0x18] sm:$0xff] %v277_v30 }
  0xf4   : > { %360 = vst [vmem:[%s164_s28 + $0x20] sm:$0xff] %v279_v32 }
  0xf5   : > { %530 = shalt.err (!%p527_p3)
}
  0xf6   : > { %s531_s10 = scalar_lea.hbm %s687_s4, 768  ;;  %s535_s19 = scalar_lea.hbm %s735_s3, 3072 }
  0xf7   : > { %p532_p4 = scmp.ne.s32.totalorder %s687_s4, %s531_s10  ;;  %p536_p9 = scmp.lt.u32.totalorder %s687_s4, %s735_s3 }
  0xf8   : > { %p537_p10 = scmp.lt.u32.totalorder %s535_s19, %s531_s10  ;;  %p539_p12 = scmp.lt.u32.totalorder %s531_s10, %s687_s4 }
  0xf9   : > { %p533_p7 = pnand %p532_p4, %p643_p5 }
  0xfa   : > { %p538_p11 = por %p537_p10, %p536_p9 }
  0xfb   : > { %p534_p8 = pneg %p533_p7 }
  0xfc   : > { %p540_p13 = por %p539_p12, %p538_p11 }
  0xfe   : > { %p541_p0 = pnand %p540_p13, %p534_p8 }
 0x100   : > { %544 = shalt.err (!%p541_p0)
}
 0x101   : > { %s583_s25 = smov 384   ;;  %s584_s26 = smov 24  }
 0x102   : > { %475 = dma.vmem_to_hbm [thread:$0]  (%p643_p5), %s682_s29, 768, %s687_s4, %s691_s5, %s583_s25, %s583_s25, %s584_s26  }
 0x103 PF: > { %p481_p1 = scmp.ge.s32.totalorder %s579_s15, 2  ;;  %s392_s27 = sand.u32 1, %s567_s12  }
 0x104   : > { %s393_s28 = scalar_lea.sflag [#allocation3], %s392_s27 }
 0x105   : > { %p478_p2 = pnand %p481_p1, %p647_p6 }
 0x107   : > { %562 = dma.done.wait (!%p478_p2), %s393_s28, 768  }
 0x108   : > { %564 = vsyncadd (!%p478_p2), %s393_s28, 4294966528  ;;  %p13_p3 = scmp.ge.s32.totalorder %s630_s18, 6   ;;  %s738_s12 = smov %s571_s13 }
 0x109   : > { %s739_s13 = smov %s575_s14  ;;  %s740_s14 = smov %s641_s21 }
 0x10a   : > { %s741_s15 = smov %s630_s18  ;;  %15 = sbr.rel (!%p13_p3) target bundleno = 3 (0x3), region = 67 }
 0x111   :  { %398 = vsyncpa [#allocation3], 1 }
 0x112   :  { %400 = vsyncpa [#allocation3 + $0x1], 1 }

</bundles_post_ra>
